<compile_context>
chip_gen: v5e
topology: v5e:2x2
jax: 0.10.0
libtpu: 0.0.40
codegen_flags: <defaults>
</compile_context>

<pallas_src>
import math

import jax
import jax.numpy as jnp
from jax.experimental import pallas as pl
from jax.experimental.pallas import tpu as pltpu


_LANE = 128      # lane width (last dim)
_SUBLANE = 8     # sublane width (second-to-last dim)

_VMEM_SOFT_BUDGET = 40 * 1024 * 1024   # working-set target; safe on v7x (64 MiB/TC)
_VMEM_LIMIT_CAP = 56 * 1024 * 1024     # explicit scoped-VMEM ceiling (under v7x physical)
_VMEM_LIMIT_FLOOR = 32 * 1024 * 1024   # never below the v6e/v7x default


def _round_up(x, m):
    return ((x + m - 1) // m) * m


def _controlnet_kernel(x_ref, w1_ref, b1_ref, w2_ref, b2_ref, w3_ref, b3_ref,
                       o_ref):
    """One batch tile, fully in VMEM: three MXU matmuls + VPU bias/ReLU/gate.

    x_ref : (tb, n_in_p) float32                  — streamed per grid step
    w*_ref: pre-transposed zero-padded (in_p, out_p), MXU dtype (bf16/f32)
    b*_ref: (1, out_p) float32                    — epilogue stays f32 on all chips
    """
    xm = x_ref[...].astype(w1_ref.dtype)                       # MXU input dtype

    h1 = jnp.dot(xm, w1_ref[...], preferred_element_type=jnp.float32)
    h1 = jnp.maximum(h1 + b1_ref[...], 0.0)                    # ReLU (f32)

    h2 = jnp.dot(h1.astype(w2_ref.dtype), w2_ref[...],
                 preferred_element_type=jnp.float32)
    h2 = jnp.maximum(h2 + b2_ref[...], 0.0)                    # ReLU (f32)

    out = jnp.dot(h2.astype(w3_ref.dtype), w3_ref[...],
                  preferred_element_type=jnp.float32) + b3_ref[...]

    # Re-read x from VMEM for the gate (late vld, short live range, f32 exact).
    o_ref[...] = (out * x_ref[...]).astype(o_ref.dtype)


def prepare_params(params, *, compute_dtype=jnp.bfloat16):
    """One-time glue (run ONCE, not per call): transpose PyTorch-convention weights
    (out,in)->(in,out), zero-pad feature dims to 128-lane multiples, cast weights to
    the MXU dtype (bf16 default — native on v5e/v6e/v7x; accumulation + epilogue stay
    f32), store biases as (1, out_p) f32 rows.

    Returns (prepped_dict, (n_input, n_hidden, n_output))  — logical dims carried out.
    """
    w1, b1, w2, b2, w3, b3 = (params["w1"], params["b1"], params["w2"],
                              params["b2"], params["w3"], params["b3"])
    n_hid, n_in = w1.shape
    n_out = w3.shape[0]
    n_in_p = _round_up(n_in, _LANE)
    n_hid_p = _round_up(n_hid, _LANE)
    n_out_p = _round_up(n_out, _LANE)

    def pad_wt(w, in_p, out_p):     # (out, in) -> zero-padded (in_p, out_p)
        wt = jnp.zeros((in_p, out_p), compute_dtype)
        return wt.at[:w.shape[1], :w.shape[0]].set(w.T.astype(compute_dtype))

    def pad_b(b, out_p):            # (out,) -> zero-padded (1, out_p) float32
        br = jnp.zeros((1, out_p), jnp.float32)
        return br.at[0, :b.shape[0]].set(b.astype(jnp.float32))

    prepped = dict(
        w1=pad_wt(w1, n_in_p, n_hid_p), b1=pad_b(b1, n_hid_p),
        w2=pad_wt(w2, n_hid_p, n_hid_p), b2=pad_b(b2, n_hid_p),
        w3=pad_wt(w3, n_hid_p, n_out_p), b3=pad_b(b3, n_out_p),
    )
    return prepped, (int(n_in), int(n_hid), int(n_out))


def _vmem_working_set(tb, n_in_p, n_hid_p, n_out_p, param_bytes, w_itemsize):
    """Conservative per-core VMEM estimate: double-buffered streaming x/out tiles,
    double-buffered resident params (worst case), plus f32 + MXU-dtype temporaries."""
    stream = 2 * tb * (n_in_p + n_out_p) * 4                 # x / out tiles, 2 buffers
    temps = tb * (n_in_p + 2 * n_hid_p + n_out_p) * 4        # f32 x, h1, h2, out
    temps += tb * (n_in_p + 2 * n_hid_p) * w_itemsize        # casts to MXU dtype
    return 2 * param_bytes + stream + temps


def controlnet_forward(x, prepped, *, dims, block_rows=1024):
    """x: (B, n_input) float32. prepped/dims: output of prepare_params()."""
    n_in, _, n_out = dims
    assert n_out == n_in, "out * x requires logical n_output == n_input"
    B, xf = x.shape
    assert xf == n_in, "x feature dim does not match prepared params"

    n_in_p, n_hid_p = prepped["w1"].shape
    n_out_p = prepped["w3"].shape[1]

    # Feature-dim zero pad ONLY (never the batch dim); skipped when 128-aligned.
    x = x.astype(jnp.float32)
    if n_in_p != n_in:
        x = jnp.pad(x, ((0, 0), (0, n_in_p - n_in)))

    # Batch tile: cap at ceil(B/2) (sublane aligned) so the parallel grid has >= 2
    # steps (dual-TC on v7x), then shrink until the VMEM working set fits the budget.
    tb = min(block_rows, max(_SUBLANE, _round_up((B + 1) // 2, _SUBLANE)))
    w_itemsize = prepped["w1"].dtype.itemsize
    param_bytes = sum(int(prepped[k].size) * prepped[k].dtype.itemsize
                      for k in ("w1", "b1", "w2", "b2", "w3", "b3"))
    while (_vmem_working_set(tb, n_in_p, n_hid_p, n_out_p, param_bytes, w_itemsize)
           > _VMEM_SOFT_BUDGET and tb > 8 * _SUBLANE):
        tb = _round_up(tb // 2, _SUBLANE)
    need = _vmem_working_set(tb, n_in_p, n_hid_p, n_out_p, param_bytes, w_itemsize)
    vmem_limit = int(min(max(int(1.4 * need), _VMEM_LIMIT_FLOOR), _VMEM_LIMIT_CAP))

    grid = (pl.cdiv(B, tb),)   # ragged last block: OOB output rows are masked stores

    cost = pl.CostEstimate(
        flops=2 * B * (n_in_p * n_hid_p + n_hid_p * n_hid_p + n_hid_p * n_out_p),
        transcendentals=0,
        bytes_accessed=int(x.size * 4 + param_bytes + B * n_out_p * 4),
    )

    resident = lambda shape: pl.BlockSpec(shape, lambda i: (0, 0))

    out = pl.pallas_call(
        _controlnet_kernel,
        out_shape=jax.ShapeDtypeStruct((B, n_out_p), jnp.float32),
        grid=grid,
        in_specs=[
            pl.BlockSpec((tb, n_in_p), lambda i: (i, 0)),          # x tile (pipelined)
            resident((n_in_p, n_hid_p)), resident((1, n_hid_p)),   # layer 1 (VMEM-resident)
            resident((n_hid_p, n_hid_p)), resident((1, n_hid_p)),  # layer 2
            resident((n_hid_p, n_out_p)), resident((1, n_out_p)),  # layer 3
        ],
        out_specs=pl.BlockSpec((tb, n_out_p), lambda i: (i, 0)),
        compiler_params=pltpu.CompilerParams(
            dimension_semantics=("parallel",),     # dual-TC sharding on v7x
            vmem_limit_bytes=vmem_limit),
        cost_estimate=cost,
    )(x, prepped["w1"], prepped["b1"], prepped["w2"], prepped["b2"],
      prepped["w3"], prepped["b3"])

    # Only the (cheap) feature-dim slice remains, and only when padding was needed.
    return out if n_out == n_out_p else out[:, :n_out]


def init_params(key, n_input, n_hidden, n_output):
    """Deterministic init mimicking torch.nn.Linear default (uniform ±1/sqrt(fan_in)),
    stored in PyTorch convention W: (out_features, in_features), b: (out,)."""
    ks = jax.random.split(key, 6)

    def lin(kw, kb, fan_in, fan_out):
        bound = 1.0 / math.sqrt(fan_in)
        w = jax.random.uniform(kw, (fan_out, fan_in), jnp.float32, -bound, bound)
        b = jax.random.uniform(kb, (fan_out,), jnp.float32, -bound, bound)
        return w, b

    w1, b1 = lin(ks[0], ks[1], n_input, n_hidden)
    w2, b2 = lin(ks[2], ks[3], n_hidden, n_hidden)
    w3, b3 = lin(ks[4], ks[5], n_hidden, n_output)
    return dict(w1=w1, b1=b1, w2=w2, b2=b2, w3=w3, b3=b3)


def reference_forward(x, p):
    h1 = jnp.maximum(x @ p["w1"].T + p["b1"], 0.0)
    h2 = jnp.maximum(h1 @ p["w2"].T + p["b2"], 0.0)
    out = h2 @ p["w3"].T + p["b3"]
    return out * x


if __name__ == "__main__":
    # Small shapes consistent with the module; n_output == n_input per forward().
    B, n_input, n_hidden, n_output = 8, 8, 32, 8

    key = jax.random.PRNGKey(0)
    kx, kp, kx2 = jax.random.split(key, 3)
    x = jax.random.normal(kx, (B, n_input), jnp.float32)
    params = init_params(kp, n_input, n_hidden, n_output)
    y_ref = reference_forward(x, params)

    fwd = jax.jit(controlnet_forward, static_argnames=("dims", "block_rows"))

    # Exact-path check (f32 weights; epilogue is always f32).
    prepped_f32, dims = prepare_params(params, compute_dtype=jnp.float32)
    y32 = jax.block_until_ready(fwd(x, prepped_f32, dims=dims))
    assert y32.shape == (B, n_output)
    assert jnp.allclose(y32, y_ref, atol=1e-5, rtol=1e-5), "f32 mismatch vs reference"

    # Default fast path: bf16 MXU weights/inputs on ALL generations, f32 accumulate/gate.
    prepped_bf16, dims = prepare_params(params)
    y16 = jax.block_until_ready(fwd(x, prepped_bf16, dims=dims))
    assert jnp.allclose(y16, y_ref, atol=5e-2, rtol=5e-2), "bf16 mismatch vs reference"

    # Ragged batch (B not a multiple of the tile) exercises the cdiv grid with masked
    # last-block stores and a >=2-step parallel grid.
    B2 = 20
    x2 = jax.random.normal(kx2, (B2, n_input), jnp.float32)
    y2 = jax.block_until_ready(fwd(x2, prepped_f32, dims=dims))
    assert y2.shape == (B2, n_output)
    assert jnp.allclose(y2, reference_forward(x2, params), atol=1e-5, rtol=1e-5), \
        "ragged-batch mismatch vs reference"

    print("KERNEL_OK")
</pallas_src>

<mosaic_0001>
module attributes {stable_mosaic.version = 11 : i64} {
  func.func @_controlnet_kernel(%arg0: i32, %arg1: memref<8x128xf32, #tpu.memory_space<vmem>>, %arg2: memref<128x128xf32, #tpu.memory_space<vmem>>, %arg3: memref<1x128xf32, #tpu.memory_space<vmem>>, %arg4: memref<128x128xf32, #tpu.memory_space<vmem>>, %arg5: memref<1x128xf32, #tpu.memory_space<vmem>>, %arg6: memref<128x128xf32, #tpu.memory_space<vmem>>, %arg7: memref<1x128xf32, #tpu.memory_space<vmem>>, %arg8: memref<8x128xf32, #tpu.memory_space<vmem>>) attributes {dimension_semantics = [#tpu.dimension_semantics<parallel>], iteration_bounds = array<i64: 1>, scalar_prefetch = 0 : i64, scratch_operands = 0 : i64, tpu.core_type = #tpu.core_type<tc>, window_params = [{transform_indices = @transform_0, window_bounds = array<i64: 8, 128>}, {pipeline_mode = #tpu.pipeline_mode<synchronous>, transform_indices = @transform_1, window_bounds = array<i64: 128, 128>}, {pipeline_mode = #tpu.pipeline_mode<synchronous>, transform_indices = @transform_2, window_bounds = array<i64: 1, 128>}, {pipeline_mode = #tpu.pipeline_mode<synchronous>, transform_indices = @transform_3, window_bounds = array<i64: 128, 128>}, {pipeline_mode = #tpu.pipeline_mode<synchronous>, transform_indices = @transform_4, window_bounds = array<i64: 1, 128>}, {pipeline_mode = #tpu.pipeline_mode<synchronous>, transform_indices = @transform_5, window_bounds = array<i64: 128, 128>}, {pipeline_mode = #tpu.pipeline_mode<synchronous>, transform_indices = @transform_6, window_bounds = array<i64: 1, 128>}, {transform_indices = @transform_7, window_bounds = array<i64: 8, 128>}]} {
    %c0 = arith.constant 0 : index
    %c0_0 = arith.constant 0 : index
    %0 = vector.load %arg1[%c0, %c0_0] : memref<8x128xf32, #tpu.memory_space<vmem>>, vector<8x128xf32>
    %c0_1 = arith.constant 0 : index
    %c0_2 = arith.constant 0 : index
    %1 = vector.load %arg2[%c0_1, %c0_2] : memref<128x128xf32, #tpu.memory_space<vmem>>, vector<128x128xf32>
    %cst = arith.constant dense<0.000000e+00> : vector<8x128xf32>
    %2 = tpu.matmul %0, %1, %cst {dimension_numbers = #tpu.dot_dimension_numbers<[1], [0], [0], [1], [0, 0, 1, 1], [], []>} : vector<8x128xf32>, vector<128x128xf32>, vector<8x128xf32> -> vector<8x128xf32>
    %c0_3 = arith.constant 0 : index
    %c0_4 = arith.constant 0 : index
    %3 = vector.load %arg3[%c0_3, %c0_4] : memref<1x128xf32, #tpu.memory_space<vmem>>, vector<1x128xf32>
    %4 = vector.broadcast %3 : vector<1x128xf32> to vector<8x128xf32>
    %5 = arith.addf %2, %4 : vector<8x128xf32>
    %cst_5 = arith.constant 0.000000e+00 : f32
    %6 = vector.broadcast %cst_5 : f32 to vector<8x128xf32>
    %7 = arith.maximumf %5, %6 : vector<8x128xf32>
    %c0_6 = arith.constant 0 : index
    %c0_7 = arith.constant 0 : index
    %8 = vector.load %arg4[%c0_6, %c0_7] : memref<128x128xf32, #tpu.memory_space<vmem>>, vector<128x128xf32>
    %cst_8 = arith.constant dense<0.000000e+00> : vector<8x128xf32>
    %9 = tpu.matmul %7, %8, %cst_8 {dimension_numbers = #tpu.dot_dimension_numbers<[1], [0], [0], [1], [0, 0, 1, 1], [], []>} : vector<8x128xf32>, vector<128x128xf32>, vector<8x128xf32> -> vector<8x128xf32>
    %c0_9 = arith.constant 0 : index
    %c0_10 = arith.constant 0 : index
    %10 = vector.load %arg5[%c0_9, %c0_10] : memref<1x128xf32, #tpu.memory_space<vmem>>, vector<1x128xf32>
    %11 = vector.broadcast %10 : vector<1x128xf32> to vector<8x128xf32>
    %12 = arith.addf %9, %11 : vector<8x128xf32>
    %cst_11 = arith.constant 0.000000e+00 : f32
    %13 = vector.broadcast %cst_11 : f32 to vector<8x128xf32>
    %14 = arith.maximumf %12, %13 : vector<8x128xf32>
    %c0_12 = arith.constant 0 : index
    %c0_13 = arith.constant 0 : index
    %15 = vector.load %arg6[%c0_12, %c0_13] : memref<128x128xf32, #tpu.memory_space<vmem>>, vector<128x128xf32>
    %cst_14 = arith.constant dense<0.000000e+00> : vector<8x128xf32>
    %16 = tpu.matmul %14, %15, %cst_14 {dimension_numbers = #tpu.dot_dimension_numbers<[1], [0], [0], [1], [0, 0, 1, 1], [], []>} : vector<8x128xf32>, vector<128x128xf32>, vector<8x128xf32> -> vector<8x128xf32>
    %c0_15 = arith.constant 0 : index
    %c0_16 = arith.constant 0 : index
    %17 = vector.load %arg7[%c0_15, %c0_16] : memref<1x128xf32, #tpu.memory_space<vmem>>, vector<1x128xf32>
    %18 = vector.broadcast %17 : vector<1x128xf32> to vector<8x128xf32>
    %19 = arith.addf %16, %18 : vector<8x128xf32>
    %c0_17 = arith.constant 0 : index
    %c0_18 = arith.constant 0 : index
    %20 = vector.load %arg1[%c0_17, %c0_18] : memref<8x128xf32, #tpu.memory_space<vmem>>, vector<8x128xf32>
    %21 = arith.mulf %19, %20 : vector<8x128xf32>
    %c0_19 = arith.constant 0 : index
    %c0_20 = arith.constant 0 : index
    %22 = vector.load %arg8[%c0_19, %c0_20] : memref<8x128xf32, #tpu.memory_space<vmem>>, vector<8x128xf32>
    tpu.vector_store %arg8[%c0_19, %c0_20], %21 {strides = array<i32>} : memref<8x128xf32, #tpu.memory_space<vmem>>, vector<8x128xf32>,
    return
  }
  func.func @transform_0(%arg0: i32) -> (i32, i32) {
    %c0_i32 = arith.constant 0 : i32
    %c0_i32_0 = arith.constant 0 : i32
    return %arg0, %c0_i32 : i32, i32
  }
  func.func @transform_1(%arg0: i32) -> (i32, i32) {
    %c0_i32 = arith.constant 0 : i32
    %c0_i32_0 = arith.constant 0 : i32
    %c0_i32_1 = arith.constant 0 : i32
    return %c0_i32, %c0_i32_0 : i32, i32
  }
  func.func @transform_2(%arg0: i32) -> (i32, i32) {
    %c0_i32 = arith.constant 0 : i32
    %c0_i32_0 = arith.constant 0 : i32
    %c0_i32_1 = arith.constant 0 : i32
    return %c0_i32, %c0_i32_0 : i32, i32
  }
  func.func @transform_3(%arg0: i32) -> (i32, i32) {
    %c0_i32 = arith.constant 0 : i32
    %c0_i32_0 = arith.constant 0 : i32
    %c0_i32_1 = arith.constant 0 : i32
    return %c0_i32, %c0_i32_0 : i32, i32
  }
  func.func @transform_4(%arg0: i32) -> (i32, i32) {
    %c0_i32 = arith.constant 0 : i32
    %c0_i32_0 = arith.constant 0 : i32
    %c0_i32_1 = arith.constant 0 : i32
    return %c0_i32, %c0_i32_0 : i32, i32
  }
  func.func @transform_5(%arg0: i32) -> (i32, i32) {
    %c0_i32 = arith.constant 0 : i32
    %c0_i32_0 = arith.constant 0 : i32
    %c0_i32_1 = arith.constant 0 : i32
    return %c0_i32, %c0_i32_0 : i32, i32
  }
  func.func @transform_6(%arg0: i32) -> (i32, i32) {
    %c0_i32 = arith.constant 0 : i32
    %c0_i32_0 = arith.constant 0 : i32
    %c0_i32_1 = arith.constant 0 : i32
    return %c0_i32, %c0_i32_0 : i32, i32
  }
  func.func @transform_7(%arg0: i32) -> (i32, i32) {
    %c0_i32 = arith.constant 0 : i32
    %c0_i32_0 = arith.constant 0 : i32
    return %arg0, %c0_i32 : i32, i32
  }
}

</mosaic_0001>

<bundles_post_ra>
// kernel: controlnet_forward.1
= control target key start
LH: loop header
LB: loop body
LE: loop exit
PB: predicated region body
PF: predicated region fallthrough
CT: control target
= control target key end

     0   :  { %12 = vsyncpa [#allocation3], 0  ;;  %s398_s0 = inlined_call_operand.vmem [shape: f32[8,128], index: 0, kind: input, shape index: {}]   ;;  %s399_s1 = inlined_call_operand.hbm [shape: f32[128,128], index: 1, kind: input, shape index: {}]   ;;  %s400_s2 = inlined_call_operand.vmem [shape: f32[1,128], index: 2, kind: input, shape index: {}]   ;;  %s401_s3 = inlined_call_operand.hbm [shape: f32[128,128], index: 3, kind: input, shape index: {}]   ;;  %s402_s4 = inlined_call_operand.vmem [shape: f32[1,128], index: 4, kind: input, shape index: {}]   ;;  %s403_s5 = inlined_call_operand.hbm [shape: f32[128,128], index: 5, kind: input, shape index: {}]   ;;  %s404_s6 = inlined_call_operand.vmem [shape: f32[1,128], index: 6, kind: input, shape index: {}]   ;;  %s405_s7 = inlined_call_operand.hbm [shape: f32[8,128], index: 7, kind: output, shape index: {}]  }
   0x1   :  { %13 = vsyncpa [#allocation6], 0 }
   0x2   :  { %14 = vsyncpa [#allocation4], 0  ;;  %s36_s26 = sshll.u32 %s401_s3, 4  ;;  %s328_s27 = smov [#allocation5]   ;;  %s37_s26 = int_to_ptr.hbm [resolvable:$true] %s36_s26 }
   0x3   :  { %s38_s28 = sshll.u32 %s328_s27, 4  ;;  %s21_s8 = sshll.u32 %s399_s1, 4  ;;  %s39_s28 = int_to_ptr.vmem [resolvable:$true] %s38_s28  ;;  %s22_s8 = int_to_ptr.hbm [resolvable:$true] %s21_s8 }
   0x4   :  { %s329_s9 = smov 128   ;;  %s330_s10 = smov 8  }
   0x5   :  { %44 = dma.hbm_to_vmem [thread:$0]  %s37_s26, 2048, %s39_s28, [#allocation6], %s329_s9, %s329_s9, %s330_s10  }
   0x6   :  { %s331_s11 = smov [#allocation2]   ;;  %s51_s15 = sshll.u32 %s403_s5, 4  ;;  %s52_s15 = int_to_ptr.hbm [resolvable:$true] %s51_s15 }
   0x7   :  { %s23_s12 = sshll.u32 %s331_s11, 4  ;;  %s332_s3 = smov [#allocation7]   ;;  %s24_s12 = int_to_ptr.vmem [resolvable:$true] %s23_s12 }
   0x8   :  { %29 = dma.hbm_to_vmem [thread:$0]  %s22_s8, 2048, %s24_s12, [#allocation3], %s329_s9, %s329_s9, %s330_s10  }
   0x9   :  { %s53_s16 = sshll.u32 %s332_s3, 4  ;;  %s54_s16 = int_to_ptr.vmem [resolvable:$true] %s53_s16 }
   0xa   :  { %59 = dma.hbm_to_vmem [thread:$0]  %s52_s15, 2048, %s54_s16, [#allocation6], %s329_s9, %s329_s9, %s330_s10  }
   0xb   :  { %322 = dma.done.wait [#allocation3], 2048  }
   0xc   :  { %323 = vsyncadd [#allocation3], 4294965248 }
   0xd   :  { %324 = dma.done.wait [#allocation6], 4096  }
   0xe   :  { %325 = vsyncadd [#allocation6], 4294963200  ;;  %v90_v0 = vld [vmem:[#allocation2 + $0x78] sm:$0xff]  ;;  %v89_v1 = vld [vmem:[#allocation2 + $0x70] sm:$0xff]  ;;  %s333_s21 = smov [#allocation8]   ;;  %s206_s25 = sshll.u32 %s405_s7, 4  ;;  %s207_s25 = int_to_ptr.hbm [resolvable:$true] %s206_s25 }
   0xf   :  { %95 = vmatpush.msra.mxu0 %v90_v0  ;;  %v88_v2 = vld [vmem:[#allocation2 + $0x68] sm:$0xff]  ;;  %v87_v3 = vld [vmem:[#allocation2 + $0x60] sm:$0xff]  ;;  %v131_v4 = vld [vmem:[#allocation5 + $0x78] sm:$0xff]  ;;  %s204_s22 = sshll.u32 %s333_s21, 4  ;;  %s205_s22 = int_to_ptr.vmem [resolvable:$true] %s204_s22 }
  0x10   :  { %v86_v5 = vld [vmem:[#allocation2 + $0x58] sm:$0xff]  ;;  %136 = vmatpush.msra.mxu1 %v131_v4  ;;  %v130_v6 = vld [vmem:[#allocation5 + $0x70] sm:$0xff]  ;;  %v129_v7 = vld [vmem:[#allocation5 + $0x68] sm:$0xff] }
  0x11   :  { %96 = vmatpush.msra.mxu0 %v89_v1  ;;  %v85_v8 = vld [vmem:[#allocation2 + $0x50] sm:$0xff]  ;;  %v128_v9 = vld [vmem:[#allocation5 + $0x60] sm:$0xff]  ;;  %v84_v10 = vld [vmem:[#allocation2 + $0x48] sm:$0xff] }
  0x12   :  { %137 = vmatpush.msra.mxu1 %v130_v6  ;;  %v127_v11 = vld [vmem:[#allocation5 + $0x58] sm:$0xff]  ;;  %v83_v12 = vld [vmem:[#allocation2 + $0x40] sm:$0xff]  ;;  %v126_v13 = vld [vmem:[#allocation5 + $0x50] sm:$0xff] }
  0x13   :  { %97 = vmatpush.msra.mxu0 %v88_v2  ;;  %v82_v14 = vld [vmem:[#allocation2 + $0x38] sm:$0xff]  ;;  %v125_v15 = vld [vmem:[#allocation5 + $0x48] sm:$0xff]  ;;  %v81_v16 = vld [vmem:[#allocation2 + $0x30] sm:$0xff] }
  0x14   :  { %138 = vmatpush.msra.mxu1 %v129_v7  ;;  %v124_v17 = vld [vmem:[#allocation5 + $0x40] sm:$0xff]  ;;  %v80_v18 = vld [vmem:[#allocation2 + $0x28] sm:$0xff]  ;;  %v123_v19 = vld [vmem:[#allocation5 + $0x38] sm:$0xff] }
  0x15   :  { %98 = vmatpush.msra.mxu0 %v87_v3  ;;  %v79_v20 = vld [vmem:[#allocation2 + $0x20] sm:$0xff]  ;;  %v122_v21 = vld [vmem:[#allocation5 + $0x30] sm:$0xff]  ;;  %v78_v22 = vld [vmem:[#allocation2 + $0x18] sm:$0xff] }
  0x16   :  { %139 = vmatpush.msra.mxu1 %v128_v9  ;;  %v121_v23 = vld [vmem:[#allocation5 + $0x28] sm:$0xff]  ;;  %v77_v24 = vld [vmem:[#allocation2 + $0x10] sm:$0xff]  ;;  %v120_v25 = vld [vmem:[#allocation5 + $0x20] sm:$0xff] }
  0x17   :  { %99 = vmatpush.msra.mxu0 %v86_v5  ;;  %v76_v26 = vld [vmem:[#allocation2 + $0x8] sm:$0xff]  ;;  %v119_v27 = vld [vmem:[#allocation5 + $0x18] sm:$0xff]  ;;  %v75_v28 = vld [vmem:[#allocation2] sm:$0xff] }
  0x18   :  { %140 = vmatpush.msra.mxu1 %v127_v11  ;;  %v74_v29 = vld [vmem:[%s398_s0] sm:$0xff]  ;;  %v118_v30 = vld [vmem:[#allocation5 + $0x10] sm:$0xff]  ;;  %v117_v31 = vld [vmem:[#allocation5 + $0x8] sm:$0xff] }
  0x19   :  { %100 = vmatpush.msra.mxu0 %v85_v8  ;;  %v116_v32 = vld [vmem:[#allocation5] sm:$0xff]  ;;  %v172_v33 = vld [vmem:[#allocation7 + $0x78] sm:$0xff]  ;;  %v171_v34 = vld [vmem:[#allocation7 + $0x70] sm:$0xff] }
  0x1a   :  { %141 = vmatpush.msra.mxu1 %v126_v13  ;;  %177 = vmatpush.msra.mxu2 %v172_v33  ;;  %v170_v35 = vld [vmem:[#allocation7 + $0x68] sm:$0xff]  ;;  %v169_v36 = vld [vmem:[#allocation7 + $0x60] sm:$0xff]  ;;  %v168_v37 = vld [vmem:[#allocation7 + $0x58] sm:$0xff] }
  0x1b   :  { %101 = vmatpush.msra.mxu0 %v84_v10  ;;  %v167_v38 = vld [vmem:[#allocation7 + $0x50] sm:$0xff]  ;;  %v166_v39 = vld [vmem:[#allocation7 + $0x48] sm:$0xff]  ;;  %v165_v40 = vld [vmem:[#allocation7 + $0x40] sm:$0xff] }
  0x1c   :  { %142 = vmatpush.msra.mxu1 %v125_v15  ;;  %178 = vmatpush.msra.mxu2 %v171_v34  ;;  %v164_v41 = vld [vmem:[#allocation7 + $0x38] sm:$0xff]  ;;  %v163_v42 = vld [vmem:[#allocation7 + $0x30] sm:$0xff]  ;;  %v162_v43 = vld [vmem:[#allocation7 + $0x28] sm:$0xff] }
  0x1d   :  { %102 = vmatpush.msra.mxu0 %v83_v12  ;;  %v161_v44 = vld [vmem:[#allocation7 + $0x20] sm:$0xff]  ;;  %v160_v45 = vld [vmem:[#allocation7 + $0x18] sm:$0xff]  ;;  %v159_v50 = vld [vmem:[#allocation7 + $0x10] sm:$0xff] }
  0x1e   :  { %143 = vmatpush.msra.mxu1 %v124_v17  ;;  %179 = vmatpush.msra.mxu2 %v170_v35  ;;  %v223_v46 = vld [vmem:[%s400_s2] ss:$0 sm:$0xff]  ;;  %v158_v51 = vld [vmem:[#allocation7 + $0x8] sm:$0xff] }
  0x1f   :  { %103 = vmatpush.msra.mxu0 %v82_v14  ;;  %v157_v52 = vld [vmem:[#allocation7] sm:$0xff] }
  0x20   :  { %144 = vmatpush.msra.mxu1 %v123_v19  ;;  %180 = vmatpush.msra.mxu2 %v169_v36  ;;  %v224_v53 = vld [vmem:[%s402_s4] ss:$0 sm:$0xff] }
  0x21   :  { %104 = vmatpush.msra.mxu0 %v81_v16  ;;  %v225_v57 = vld [vmem:[%s404_s6] ss:$0 sm:$0xff] }
  0x22   :  { %145 = vmatpush.msra.mxu1 %v122_v21  ;;  %181 = vmatpush.msra.mxu2 %v168_v37 }
  0x23   :  { %105 = vmatpush.msra.mxu0 %v80_v18 }
  0x24   :  { %146 = vmatpush.msra.mxu1 %v121_v23  ;;  %182 = vmatpush.msra.mxu2 %v167_v38 }
  0x25   :  { %106 = vmatpush.msra.mxu0 %v79_v20 }
  0x26   :  { %147 = vmatpush.msra.mxu1 %v120_v25  ;;  %183 = vmatpush.msra.mxu2 %v166_v39 }
  0x27   :  { %107 = vmatpush.msra.mxu0 %v78_v22 }
  0x28   :  { %148 = vmatpush.msra.mxu1 %v119_v27  ;;  %184 = vmatpush.msra.mxu2 %v165_v40 }
  0x29   :  { %108 = vmatpush.msra.mxu0 %v77_v24 }
  0x2a   :  { %149 = vmatpush.msra.mxu1 %v118_v30  ;;  %185 = vmatpush.msra.mxu2 %v164_v41 }
  0x2b   :  { %109 = vmatpush.msra.mxu0 %v76_v26 }
  0x2c   :  { %150 = vmatpush.msra.mxu1 %v117_v31  ;;  %186 = vmatpush.msra.mxu2 %v163_v42 }
  0x2d   :  { %110 = vmatpush.msra.mxu0 %v75_v28 }
  0x2e   :  { %111 = vmatmul.f32.vlgmr.msra.gmra.mxu0 %v74_v29  ;;  %151 = vmatpush.msra.mxu1 %v116_v32 }
  0x2f   :  { %187 = vmatpush.msra.mxu2 %v162_v43 }
  0x31   :  { %188 = vmatpush.msra.mxu2 %v161_v44 }
  0x33   :  { %189 = vmatpush.msra.mxu2 %v160_v45 }
  0x35   :  { %190 = vmatpush.msra.mxu2 %v159_v50 }
  0x37   :  { %191 = vmatpush.msra.mxu2 %v158_v51 }
  0x39   :  { %192 = vmatpush.msra.mxu2 %v157_v52 }
  0xab   :  { %v112_v47 = vpop.f32.mrf.mxu0 }
  0xac   :  { %v113_v48 = vadd.f32 %v223_v46, %v112_v47 }
  0xae   :  { %v115_v49 = vmax.f32 %v113_v48, 0.0 }
  0xb0   :  { %152 = vmatmul.f32.vlgmr.msra.gmra.mxu1 %v115_v49 }
 0x12d   :  { %v153_v54 = vpop.f32.mrf.mxu1 }
 0x12e   :  { %v154_v55 = vadd.f32 %v224_v53, %v153_v54 }
 0x130   :  { %v156_v56 = vmax.f32 %v154_v55, 0.0 }
 0x132   :  { %193 = vmatmul.f32.vlgmr.msra.gmra.mxu2 %v156_v56 }
 0x1b5   :  { %v194_v58 = vpop.f32.mrf.mxu2 }
 0x1b6   :  { %v195_v59 = vadd.f32 %v225_v57, %v194_v58 }
 0x1b8   :  { %v197_v60 = vmul.f32 %v195_v59, %v74_v29 }
 0x1ba   :  { %198 = vst [vmem:[#allocation8] sm:$0xff] %v197_v60 }
 0x1bb   :  { %209 = dma.vmem_to_hbm [thread:$0]  %s205_s22, 128, %s207_s25, [#allocation4]  }
 0x1bc   :  { %326 = dma.done.wait [#allocation4], 128  }
 0x1bd   :  { %327 = vsyncadd [#allocation4], 4294967168 }
 0x1be   :  { %214 = vsyncpa [#allocation3], 1 }
 0x1bf   :  { %215 = vsyncpa [#allocation6], 1 }
 0x1c0   :  { %216 = vsyncpa [#allocation4], 1 }

</bundles_post_ra>
